<compile_context>
chip_gen: v7x
topology: tpu7x:2x2x1
jax: 0.10.0
libtpu: 0.0.40
codegen_flags: <defaults>
</compile_context>

<pallas_src>
import jax
import jax.numpy as jnp
from jax.experimental import pallas as pl
from jax.experimental.pallas import tpu as pltpu

# ----------------------------- model dims -----------------------------------
VOCAB_SIZE = 6          # unique tokens in the original corpus
EMBED_DIM = 16
HIDDEN_DIM = 32
SEQ_LEN = 8

VOCAB_PAD = 8           # sublane-aligned padded vocab rows for the proj table
OUT_PAD = 128           # lane-dense padded fc output width


# ------------------------------ Pallas kernel --------------------------------
def mini_lstm_kernel(tok_ref, embed_ref, wih_ref, whh_ref, b_ref,
                     wfc_ref, bfc_ref, out_ref, proj_scr):
    """Full forward: embed gather + LSTM recurrence + final Linear.

    tok_ref  : (SEQ_LEN,) int32 in SMEM        token ids
    embed_ref: (VOCAB_PAD, EMBED_DIM)          embedding table (zero-padded rows)
    wih_ref  : (EMBED_DIM, 4H)                 input->gates weights, gate order i|f|o|g
    whh_ref  : (HIDDEN_DIM, 4H)                hidden->gates weights, gate order i|f|o|g
    b_ref    : (1, 4H)                         b_ih + b_hh (reordered)
    wfc_ref  : (HIDDEN_DIM, OUT_PAD)           fc weight, padded to 128 lanes
    bfc_ref  : (1, OUT_PAD)                    fc bias, padded
    out_ref  : (1, OUT_PAD)                    padded logits for last time step
    proj_scr : (VOCAB_PAD, 4H) f32 VMEM        hoisted per-token gate pre-activations
    """
    H = HIDDEN_DIM

    # Hoisted input projection + bias, one batched MXU matmul (M=8, not M=1).
    proj_scr[...] = (
        jnp.dot(embed_ref[...], wih_ref[...], preferred_element_type=jnp.float32)
        + b_ref[...]
    )

    # LSTM state lives in registers; (1, 32) is a fraction of one vreg.
    h = jnp.zeros((1, H), jnp.float32)
    c = jnp.zeros((1, H), jnp.float32)

    # Fully unrolled recurrence (SEQ_LEN is static and tiny).
    for t in range(SEQ_LEN):
        xw_t = proj_scr[pl.ds(tok_ref[t], 1), :]                      # (1, 4H)
        gates = xw_t + jnp.dot(h, whh_ref[...],
                               preferred_element_type=jnp.float32)    # (1, 4H)
        # gate order i | f | o | g -> one contiguous sigmoid, one tanh
        sig = jax.nn.sigmoid(gates[:, : 3 * H])
        i_g = sig[:, 0 * H:1 * H]
        f_g = sig[:, 1 * H:2 * H]
        o_g = sig[:, 2 * H:3 * H]
        g_g = jnp.tanh(gates[:, 3 * H:4 * H])
        c = f_g * c + i_g * g_g
        h = o_g * jnp.tanh(c)

    # Final Linear on h_T; 128-lane padded output -> single unmasked store.
    out_ref[...] = (
        jnp.dot(h, wfc_ref[...], preferred_element_type=jnp.float32)
        + bfc_ref[...]
    )


def mini_lstm_forward(x_tokens, params):
    """Wrapper: lay out weights (gate-reordered, transposed, lane-padded) and
    run the whole forward in one Pallas call."""
    embed, w_ih, w_hh, b_ih, b_hh, w_fc, b_fc = (
        params["embed"], params["w_ih"], params["w_hh"],
        params["b_ih"], params["b_hh"], params["w_fc"], params["b_fc"],
    )
    H = HIDDEN_DIM

    def reorder_gates(m):
        # PyTorch gate order along 4H axis: i | f | g | o  ->  i | f | o | g
        return jnp.concatenate(
            [m[0 * H:1 * H], m[1 * H:2 * H], m[3 * H:4 * H], m[2 * H:3 * H]],
            axis=0)

    # Embedding table padded to a sublane-aligned row count (extra rows unused).
    embed_pad = jnp.zeros((VOCAB_PAD, EMBED_DIM), jnp.float32)
    embed_pad = embed_pad.at[:VOCAB_SIZE].set(embed.astype(jnp.float32))

    wih_t = reorder_gates(w_ih).T                                   # (E, 4H)
    whh_t = reorder_gates(w_hh).T                                   # (H, 4H)
    bias = reorder_gates((b_ih + b_hh).reshape(-1, 1)).reshape(1, -1)  # (1, 4H)

    # fc weight/bias padded to 128 output lanes (lane-dense final store).
    wfc_pad = jnp.zeros((H, OUT_PAD), jnp.float32).at[:, :VOCAB_SIZE].set(w_fc.T)
    bfc_pad = jnp.zeros((1, OUT_PAD), jnp.float32).at[:, :VOCAB_SIZE].set(
        b_fc.reshape(1, -1))

    vmem = pl.BlockSpec(memory_space=pltpu.MemorySpace.VMEM)
    smem = pl.BlockSpec(memory_space=pltpu.MemorySpace.SMEM)

    out_pad = pl.pallas_call(
        mini_lstm_kernel,
        out_shape=jax.ShapeDtypeStruct((1, OUT_PAD), jnp.float32),
        in_specs=[smem, vmem, vmem, vmem, vmem, vmem, vmem],
        out_specs=vmem,
        scratch_shapes=[
            pltpu.VMEM((VOCAB_PAD, 4 * HIDDEN_DIM), jnp.float32),   # proj table
        ],
    )(x_tokens.astype(jnp.int32), embed_pad, wih_t, whh_t, bias, wfc_pad, bfc_pad)

    return out_pad[:, :VOCAB_SIZE]  # (1, VOCAB_SIZE), matches fc(x[-1])


# ------------------------------ reference ------------------------------------
def mini_lstm_reference(x_tokens, params):
    embed, w_ih, w_hh, b_ih, b_hh, w_fc, b_fc = (
        params["embed"], params["w_ih"], params["w_hh"],
        params["b_ih"], params["b_hh"], params["w_fc"], params["b_fc"],
    )
    x_emb = jnp.take(embed, x_tokens, axis=0)
    H = HIDDEN_DIM
    h = jnp.zeros((1, H), jnp.float32)
    c = jnp.zeros((1, H), jnp.float32)
    for t in range(x_emb.shape[0]):
        gates = x_emb[t:t + 1] @ w_ih.T + h @ w_hh.T + b_ih + b_hh
        i_g = jax.nn.sigmoid(gates[:, 0 * H:1 * H])
        f_g = jax.nn.sigmoid(gates[:, 1 * H:2 * H])
        g_g = jnp.tanh(gates[:, 2 * H:3 * H])
        o_g = jax.nn.sigmoid(gates[:, 3 * H:4 * H])
        c = f_g * c + i_g * g_g
        h = o_g * jnp.tanh(c)
    return h @ w_fc.T + b_fc.reshape(1, -1)


# -------------------------------- main ----------------------------------------
if __name__ == "__main__":
    key = jax.random.PRNGKey(0)
    ks = jax.random.split(key, 8)
    scale = 0.1
    params = {
        "embed": scale * jax.random.normal(ks[0], (VOCAB_SIZE, EMBED_DIM), jnp.float32),
        "w_ih": scale * jax.random.normal(ks[1], (4 * HIDDEN_DIM, EMBED_DIM), jnp.float32),
        "w_hh": scale * jax.random.normal(ks[2], (4 * HIDDEN_DIM, HIDDEN_DIM), jnp.float32),
        "b_ih": scale * jax.random.normal(ks[3], (4 * HIDDEN_DIM,), jnp.float32),
        "b_hh": scale * jax.random.normal(ks[4], (4 * HIDDEN_DIM,), jnp.float32),
        "w_fc": scale * jax.random.normal(ks[5], (VOCAB_SIZE, HIDDEN_DIM), jnp.float32),
        "b_fc": scale * jax.random.normal(ks[6], (VOCAB_SIZE,), jnp.float32),
    }
    x_tokens = jax.random.randint(ks[7], (SEQ_LEN,), 0, VOCAB_SIZE, dtype=jnp.int32)

    logits = mini_lstm_forward(x_tokens, params)
    jax.block_until_ready(logits)

    ref = mini_lstm_reference(x_tokens, params)
    assert logits.shape == (1, VOCAB_SIZE)
    assert jnp.allclose(logits, ref, rtol=1e-3, atol=1e-3), (logits, ref)

    print("KERNEL_OK")
</pallas_src>

<mosaic_0001>
module attributes {stable_mosaic.version = 11 : i64} {
  func.func @mini_lstm_kernel(%arg0: memref<8xi32, #tpu.memory_space<smem>>, %arg1: memref<8x16xf32, #tpu.memory_space<vmem>>, %arg2: memref<16x128xf32, #tpu.memory_space<vmem>>, %arg3: memref<32x128xf32, #tpu.memory_space<vmem>>, %arg4: memref<1x128xf32, #tpu.memory_space<vmem>>, %arg5: memref<32x128xf32, #tpu.memory_space<vmem>>, %arg6: memref<1x128xf32, #tpu.memory_space<vmem>>, %arg7: memref<1x128xf32, #tpu.memory_space<vmem>>, %arg8: memref<8x128xf32, #tpu.memory_space<vmem>>) attributes {dimension_semantics = [], scalar_prefetch = 0 : i64, scratch_operands = 1 : i64, tpu.core_type = #tpu.core_type<tc>} {
    %c0 = arith.constant 0 : index
    %c0_0 = arith.constant 0 : index
    %0 = vector.load %arg1[%c0, %c0_0] : memref<8x16xf32, #tpu.memory_space<vmem>>, vector<8x16xf32>
    %c0_1 = arith.constant 0 : index
    %c0_2 = arith.constant 0 : index
    %1 = vector.load %arg2[%c0_1, %c0_2] : memref<16x128xf32, #tpu.memory_space<vmem>>, vector<16x128xf32>
    %cst = arith.constant dense<0.000000e+00> : vector<8x128xf32>
    %2 = tpu.matmul %0, %1, %cst {dimension_numbers = #tpu.dot_dimension_numbers<[1], [0], [0], [1], [0, 0, 1, 1], [], []>} : vector<8x16xf32>, vector<16x128xf32>, vector<8x128xf32> -> vector<8x128xf32>
    %c0_3 = arith.constant 0 : index
    %c0_4 = arith.constant 0 : index
    %3 = vector.load %arg4[%c0_3, %c0_4] : memref<1x128xf32, #tpu.memory_space<vmem>>, vector<1x128xf32>
    %4 = vector.broadcast %3 : vector<1x128xf32> to vector<8x128xf32>
    %5 = arith.addf %2, %4 : vector<8x128xf32>
    %c0_5 = arith.constant 0 : index
    %c0_6 = arith.constant 0 : index
    %6 = vector.load %arg8[%c0_5, %c0_6] : memref<8x128xf32, #tpu.memory_space<vmem>>, vector<8x128xf32>
    tpu.vector_store %arg8[%c0_5, %c0_6], %5 {strides = array<i32>} : memref<8x128xf32, #tpu.memory_space<vmem>>, vector<8x128xf32>,
    %cst_7 = arith.constant 0.000000e+00 : f32
    %7 = vector.broadcast %cst_7 : f32 to vector<1x32xf32>
    %cst_8 = arith.constant 0.000000e+00 : f32
    %8 = vector.broadcast %cst_8 : f32 to vector<1x32xf32>
    %c0_9 = arith.constant 0 : index
    %9 = memref.load %arg0[%c0_9] : memref<8xi32, #tpu.memory_space<smem>>
    %10 = arith.index_cast %9 : i32 to index
    %c0_10 = arith.constant 0 : index
    %11 = vector.load %arg8[%10, %c0_10] : memref<8x128xf32, #tpu.memory_space<vmem>>, vector<1x128xf32>
    %c0_11 = arith.constant 0 : index
    %c0_12 = arith.constant 0 : index
    %12 = vector.load %arg3[%c0_11, %c0_12] : memref<32x128xf32, #tpu.memory_space<vmem>>, vector<32x128xf32>
    %cst_13 = arith.constant dense<0.000000e+00> : vector<1x128xf32>
    %13 = tpu.matmul %7, %12, %cst_13 {dimension_numbers = #tpu.dot_dimension_numbers<[1], [0], [0], [1], [0, 0, 1, 1], [], []>} : vector<1x32xf32>, vector<32x128xf32>, vector<1x128xf32> -> vector<1x128xf32>
    %14 = arith.addf %11, %13 : vector<1x128xf32>
    %15 = vector.extract_strided_slice %14 {offsets = [0, 0], sizes = [1, 96], strides = [1, 1]} : vector<1x128xf32> to vector<1x96xf32>
    %16 = arith.negf %15 : vector<1x96xf32>
    %17 = math.exp %16 : vector<1x96xf32>
    %cst_14 = arith.constant 1.000000e+00 : f32
    %18 = vector.broadcast %cst_14 : f32 to vector<1x96xf32>
    %19 = arith.addf %18, %17 : vector<1x96xf32>
    %20 = arith.divf %18, %19 : vector<1x96xf32>
    %21 = vector.extract_strided_slice %20 {offsets = [0, 0], sizes = [1, 32], strides = [1, 1]} : vector<1x96xf32> to vector<1x32xf32>
    %22 = vector.extract_strided_slice %20 {offsets = [0, 32], sizes = [1, 32], strides = [1, 1]} : vector<1x96xf32> to vector<1x32xf32>
    %23 = vector.extract_strided_slice %20 {offsets = [0, 64], sizes = [1, 32], strides = [1, 1]} : vector<1x96xf32> to vector<1x32xf32>
    %24 = vector.extract_strided_slice %14 {offsets = [0, 96], sizes = [1, 32], strides = [1, 1]} : vector<1x128xf32> to vector<1x32xf32>
    %25 = math.tanh %24 : vector<1x32xf32>
    %26 = arith.mulf %22, %8 : vector<1x32xf32>
    %27 = arith.mulf %21, %25 : vector<1x32xf32>
    %28 = arith.addf %26, %27 : vector<1x32xf32>
    %29 = math.tanh %28 : vector<1x32xf32>
    %30 = arith.mulf %23, %29 : vector<1x32xf32>
    %c1 = arith.constant 1 : index
    %31 = memref.load %arg0[%c1] : memref<8xi32, #tpu.memory_space<smem>>
    %32 = arith.index_cast %31 : i32 to index
    %c0_15 = arith.constant 0 : index
    %33 = vector.load %arg8[%32, %c0_15] : memref<8x128xf32, #tpu.memory_space<vmem>>, vector<1x128xf32>
    %c0_16 = arith.constant 0 : index
    %c0_17 = arith.constant 0 : index
    %34 = vector.load %arg3[%c0_16, %c0_17] : memref<32x128xf32, #tpu.memory_space<vmem>>, vector<32x128xf32>
    %cst_18 = arith.constant dense<0.000000e+00> : vector<1x128xf32>
    %35 = tpu.matmul %30, %34, %cst_18 {dimension_numbers = #tpu.dot_dimension_numbers<[1], [0], [0], [1], [0, 0, 1, 1], [], []>} : vector<1x32xf32>, vector<32x128xf32>, vector<1x128xf32> -> vector<1x128xf32>
    %36 = arith.addf %33, %35 : vector<1x128xf32>
    %37 = vector.extract_strided_slice %36 {offsets = [0, 0], sizes = [1, 96], strides = [1, 1]} : vector<1x128xf32> to vector<1x96xf32>
    %38 = arith.negf %37 : vector<1x96xf32>
    %39 = math.exp %38 : vector<1x96xf32>
    %cst_19 = arith.constant 1.000000e+00 : f32
    %40 = vector.broadcast %cst_19 : f32 to vector<1x96xf32>
    %41 = arith.addf %40, %39 : vector<1x96xf32>
    %42 = arith.divf %40, %41 : vector<1x96xf32>
    %43 = vector.extract_strided_slice %42 {offsets = [0, 0], sizes = [1, 32], strides = [1, 1]} : vector<1x96xf32> to vector<1x32xf32>
    %44 = vector.extract_strided_slice %42 {offsets = [0, 32], sizes = [1, 32], strides = [1, 1]} : vector<1x96xf32> to vector<1x32xf32>
    %45 = vector.extract_strided_slice %42 {offsets = [0, 64], sizes = [1, 32], strides = [1, 1]} : vector<1x96xf32> to vector<1x32xf32>
    %46 = vector.extract_strided_slice %36 {offsets = [0, 96], sizes = [1, 32], strides = [1, 1]} : vector<1x128xf32> to vector<1x32xf32>
    %47 = math.tanh %46 : vector<1x32xf32>
    %48 = arith.mulf %44, %28 : vector<1x32xf32>
    %49 = arith.mulf %43, %47 : vector<1x32xf32>
    %50 = arith.addf %48, %49 : vector<1x32xf32>
    %51 = math.tanh %50 : vector<1x32xf32>
    %52 = arith.mulf %45, %51 : vector<1x32xf32>
    %c2 = arith.constant 2 : index
    %53 = memref.load %arg0[%c2] : memref<8xi32, #tpu.memory_space<smem>>
    %54 = arith.index_cast %53 : i32 to index
    %c0_20 = arith.constant 0 : index
    %55 = vector.load %arg8[%54, %c0_20] : memref<8x128xf32, #tpu.memory_space<vmem>>, vector<1x128xf32>
    %c0_21 = arith.constant 0 : index
    %c0_22 = arith.constant 0 : index
    %56 = vector.load %arg3[%c0_21, %c0_22] : memref<32x128xf32, #tpu.memory_space<vmem>>, vector<32x128xf32>
    %cst_23 = arith.constant dense<0.000000e+00> : vector<1x128xf32>
    %57 = tpu.matmul %52, %56, %cst_23 {dimension_numbers = #tpu.dot_dimension_numbers<[1], [0], [0], [1], [0, 0, 1, 1], [], []>} : vector<1x32xf32>, vector<32x128xf32>, vector<1x128xf32> -> vector<1x128xf32>
    %58 = arith.addf %55, %57 : vector<1x128xf32>
    %59 = vector.extract_strided_slice %58 {offsets = [0, 0], sizes = [1, 96], strides = [1, 1]} : vector<1x128xf32> to vector<1x96xf32>
    %60 = arith.negf %59 : vector<1x96xf32>
    %61 = math.exp %60 : vector<1x96xf32>
    %cst_24 = arith.constant 1.000000e+00 : f32
    %62 = vector.broadcast %cst_24 : f32 to vector<1x96xf32>
    %63 = arith.addf %62, %61 : vector<1x96xf32>
    %64 = arith.divf %62, %63 : vector<1x96xf32>
    %65 = vector.extract_strided_slice %64 {offsets = [0, 0], sizes = [1, 32], strides = [1, 1]} : vector<1x96xf32> to vector<1x32xf32>
    %66 = vector.extract_strided_slice %64 {offsets = [0, 32], sizes = [1, 32], strides = [1, 1]} : vector<1x96xf32> to vector<1x32xf32>
    %67 = vector.extract_strided_slice %64 {offsets = [0, 64], sizes = [1, 32], strides = [1, 1]} : vector<1x96xf32> to vector<1x32xf32>
    %68 = vector.extract_strided_slice %58 {offsets = [0, 96], sizes = [1, 32], strides = [1, 1]} : vector<1x128xf32> to vector<1x32xf32>
    %69 = math.tanh %68 : vector<1x32xf32>
    %70 = arith.mulf %66, %50 : vector<1x32xf32>
    %71 = arith.mulf %65, %69 : vector<1x32xf32>
    %72 = arith.addf %70, %71 : vector<1x32xf32>
    %73 = math.tanh %72 : vector<1x32xf32>
    %74 = arith.mulf %67, %73 : vector<1x32xf32>
    %c3 = arith.constant 3 : index
    %75 = memref.load %arg0[%c3] : memref<8xi32, #tpu.memory_space<smem>>
    %76 = arith.index_cast %75 : i32 to index
    %c0_25 = arith.constant 0 : index
    %77 = vector.load %arg8[%76, %c0_25] : memref<8x128xf32, #tpu.memory_space<vmem>>, vector<1x128xf32>
    %c0_26 = arith.constant 0 : index
    %c0_27 = arith.constant 0 : index
    %78 = vector.load %arg3[%c0_26, %c0_27] : memref<32x128xf32, #tpu.memory_space<vmem>>, vector<32x128xf32>
    %cst_28 = arith.constant dense<0.000000e+00> : vector<1x128xf32>
    %79 = tpu.matmul %74, %78, %cst_28 {dimension_numbers = #tpu.dot_dimension_numbers<[1], [0], [0], [1], [0, 0, 1, 1], [], []>} : vector<1x32xf32>, vector<32x128xf32>, vector<1x128xf32> -> vector<1x128xf32>
    %80 = arith.addf %77, %79 : vector<1x128xf32>
    %81 = vector.extract_strided_slice %80 {offsets = [0, 0], sizes = [1, 96], strides = [1, 1]} : vector<1x128xf32> to vector<1x96xf32>
    %82 = arith.negf %81 : vector<1x96xf32>
    %83 = math.exp %82 : vector<1x96xf32>
    %cst_29 = arith.constant 1.000000e+00 : f32
    %84 = vector.broadcast %cst_29 : f32 to vector<1x96xf32>
    %85 = arith.addf %84, %83 : vector<1x96xf32>
    %86 = arith.divf %84, %85 : vector<1x96xf32>
    %87 = vector.extract_strided_slice %86 {offsets = [0, 0], sizes = [1, 32], strides = [1, 1]} : vector<1x96xf32> to vector<1x32xf32>
    %88 = vector.extract_strided_slice %86 {offsets = [0, 32], sizes = [1, 32], strides = [1, 1]} : vector<1x96xf32> to vector<1x32xf32>
    %89 = vector.extract_strided_slice %86 {offsets = [0, 64], sizes = [1, 32], strides = [1, 1]} : vector<1x96xf32> to vector<1x32xf32>
    %90 = vector.extract_strided_slice %80 {offsets = [0, 96], sizes = [1, 32], strides = [1, 1]} : vector<1x128xf32> to vector<1x32xf32>
    %91 = math.tanh %90 : vector<1x32xf32>
    %92 = arith.mulf %88, %72 : vector<1x32xf32>
    %93 = arith.mulf %87, %91 : vector<1x32xf32>
    %94 = arith.addf %92, %93 : vector<1x32xf32>
    %95 = math.tanh %94 : vector<1x32xf32>
    %96 = arith.mulf %89, %95 : vector<1x32xf32>
    %c4 = arith.constant 4 : index
    %97 = memref.load %arg0[%c4] : memref<8xi32, #tpu.memory_space<smem>>
    %98 = arith.index_cast %97 : i32 to index
    %c0_30 = arith.constant 0 : index
    %99 = vector.load %arg8[%98, %c0_30] : memref<8x128xf32, #tpu.memory_space<vmem>>, vector<1x128xf32>
    %c0_31 = arith.constant 0 : index
    %c0_32 = arith.constant 0 : index
    %100 = vector.load %arg3[%c0_31, %c0_32] : memref<32x128xf32, #tpu.memory_space<vmem>>, vector<32x128xf32>
    %cst_33 = arith.constant dense<0.000000e+00> : vector<1x128xf32>
    %101 = tpu.matmul %96, %100, %cst_33 {dimension_numbers = #tpu.dot_dimension_numbers<[1], [0], [0], [1], [0, 0, 1, 1], [], []>} : vector<1x32xf32>, vector<32x128xf32>, vector<1x128xf32> -> vector<1x128xf32>
    %102 = arith.addf %99, %101 : vector<1x128xf32>
    %103 = vector.extract_strided_slice %102 {offsets = [0, 0], sizes = [1, 96], strides = [1, 1]} : vector<1x128xf32> to vector<1x96xf32>
    %104 = arith.negf %103 : vector<1x96xf32>
    %105 = math.exp %104 : vector<1x96xf32>
    %cst_34 = arith.constant 1.000000e+00 : f32
    %106 = vector.broadcast %cst_34 : f32 to vector<1x96xf32>
    %107 = arith.addf %106, %105 : vector<1x96xf32>
    %108 = arith.divf %106, %107 : vector<1x96xf32>
    %109 = vector.extract_strided_slice %108 {offsets = [0, 0], sizes = [1, 32], strides = [1, 1]} : vector<1x96xf32> to vector<1x32xf32>
    %110 = vector.extract_strided_slice %108 {offsets = [0, 32], sizes = [1, 32], strides = [1, 1]} : vector<1x96xf32> to vector<1x32xf32>
    %111 = vector.extract_strided_slice %108 {offsets = [0, 64], sizes = [1, 32], strides = [1, 1]} : vector<1x96xf32> to vector<1x32xf32>
    %112 = vector.extract_strided_slice %102 {offsets = [0, 96], sizes = [1, 32], strides = [1, 1]} : vector<1x128xf32> to vector<1x32xf32>
    %113 = math.tanh %112 : vector<1x32xf32>
    %114 = arith.mulf %110, %94 : vector<1x32xf32>
    %115 = arith.mulf %109, %113 : vector<1x32xf32>
    %116 = arith.addf %114, %115 : vector<1x32xf32>
    %117 = math.tanh %116 : vector<1x32xf32>
    %118 = arith.mulf %111, %117 : vector<1x32xf32>
    %c5 = arith.constant 5 : index
    %119 = memref.load %arg0[%c5] : memref<8xi32, #tpu.memory_space<smem>>
    %120 = arith.index_cast %119 : i32 to index
    %c0_35 = arith.constant 0 : index
    %121 = vector.load %arg8[%120, %c0_35] : memref<8x128xf32, #tpu.memory_space<vmem>>, vector<1x128xf32>
    %c0_36 = arith.constant 0 : index
    %c0_37 = arith.constant 0 : index
    %122 = vector.load %arg3[%c0_36, %c0_37] : memref<32x128xf32, #tpu.memory_space<vmem>>, vector<32x128xf32>
    %cst_38 = arith.constant dense<0.000000e+00> : vector<1x128xf32>
    %123 = tpu.matmul %118, %122, %cst_38 {dimension_numbers = #tpu.dot_dimension_numbers<[1], [0], [0], [1], [0, 0, 1, 1], [], []>} : vector<1x32xf32>, vector<32x128xf32>, vector<1x128xf32> -> vector<1x128xf32>
    %124 = arith.addf %121, %123 : vector<1x128xf32>
    %125 = vector.extract_strided_slice %124 {offsets = [0, 0], sizes = [1, 96], strides = [1, 1]} : vector<1x128xf32> to vector<1x96xf32>
    %126 = arith.negf %125 : vector<1x96xf32>
    %127 = math.exp %126 : vector<1x96xf32>
    %cst_39 = arith.constant 1.000000e+00 : f32
    %128 = vector.broadcast %cst_39 : f32 to vector<1x96xf32>
    %129 = arith.addf %128, %127 : vector<1x96xf32>
    %130 = arith.divf %128, %129 : vector<1x96xf32>
    %131 = vector.extract_strided_slice %130 {offsets = [0, 0], sizes = [1, 32], strides = [1, 1]} : vector<1x96xf32> to vector<1x32xf32>
    %132 = vector.extract_strided_slice %130 {offsets = [0, 32], sizes = [1, 32], strides = [1, 1]} : vector<1x96xf32> to vector<1x32xf32>
    %133 = vector.extract_strided_slice %130 {offsets = [0, 64], sizes = [1, 32], strides = [1, 1]} : vector<1x96xf32> to vector<1x32xf32>
    %134 = vector.extract_strided_slice %124 {offsets = [0, 96], sizes = [1, 32], strides = [1, 1]} : vector<1x128xf32> to vector<1x32xf32>
    %135 = math.tanh %134 : vector<1x32xf32>
    %136 = arith.mulf %132, %116 : vector<1x32xf32>
    %137 = arith.mulf %131, %135 : vector<1x32xf32>
    %138 = arith.addf %136, %137 : vector<1x32xf32>
    %139 = math.tanh %138 : vector<1x32xf32>
    %140 = arith.mulf %133, %139 : vector<1x32xf32>
    %c6 = arith.constant 6 : index
    %141 = memref.load %arg0[%c6] : memref<8xi32, #tpu.memory_space<smem>>
    %142 = arith.index_cast %141 : i32 to index
    %c0_40 = arith.constant 0 : index
    %143 = vector.load %arg8[%142, %c0_40] : memref<8x128xf32, #tpu.memory_space<vmem>>, vector<1x128xf32>
    %c0_41 = arith.constant 0 : index
    %c0_42 = arith.constant 0 : index
    %144 = vector.load %arg3[%c0_41, %c0_42] : memref<32x128xf32, #tpu.memory_space<vmem>>, vector<32x128xf32>
    %cst_43 = arith.constant dense<0.000000e+00> : vector<1x128xf32>
    %145 = tpu.matmul %140, %144, %cst_43 {dimension_numbers = #tpu.dot_dimension_numbers<[1], [0], [0], [1], [0, 0, 1, 1], [], []>} : vector<1x32xf32>, vector<32x128xf32>, vector<1x128xf32> -> vector<1x128xf32>
    %146 = arith.addf %143, %145 : vector<1x128xf32>
    %147 = vector.extract_strided_slice %146 {offsets = [0, 0], sizes = [1, 96], strides = [1, 1]} : vector<1x128xf32> to vector<1x96xf32>
    %148 = arith.negf %147 : vector<1x96xf32>
    %149 = math.exp %148 : vector<1x96xf32>
    %cst_44 = arith.constant 1.000000e+00 : f32
    %150 = vector.broadcast %cst_44 : f32 to vector<1x96xf32>
    %151 = arith.addf %150, %149 : vector<1x96xf32>
    %152 = arith.divf %150, %151 : vector<1x96xf32>
    %153 = vector.extract_strided_slice %152 {offsets = [0, 0], sizes = [1, 32], strides = [1, 1]} : vector<1x96xf32> to vector<1x32xf32>
    %154 = vector.extract_strided_slice %152 {offsets = [0, 32], sizes = [1, 32], strides = [1, 1]} : vector<1x96xf32> to vector<1x32xf32>
    %155 = vector.extract_strided_slice %152 {offsets = [0, 64], sizes = [1, 32], strides = [1, 1]} : vector<1x96xf32> to vector<1x32xf32>
    %156 = vector.extract_strided_slice %146 {offsets = [0, 96], sizes = [1, 32], strides = [1, 1]} : vector<1x128xf32> to vector<1x32xf32>
    %157 = math.tanh %156 : vector<1x32xf32>
    %158 = arith.mulf %154, %138 : vector<1x32xf32>
    %159 = arith.mulf %153, %157 : vector<1x32xf32>
    %160 = arith.addf %158, %159 : vector<1x32xf32>
    %161 = math.tanh %160 : vector<1x32xf32>
    %162 = arith.mulf %155, %161 : vector<1x32xf32>
    %c7 = arith.constant 7 : index
    %163 = memref.load %arg0[%c7] : memref<8xi32, #tpu.memory_space<smem>>
    %164 = arith.index_cast %163 : i32 to index
    %c0_45 = arith.constant 0 : index
    %165 = vector.load %arg8[%164, %c0_45] : memref<8x128xf32, #tpu.memory_space<vmem>>, vector<1x128xf32>
    %c0_46 = arith.constant 0 : index
    %c0_47 = arith.constant 0 : index
    %166 = vector.load %arg3[%c0_46, %c0_47] : memref<32x128xf32, #tpu.memory_space<vmem>>, vector<32x128xf32>
    %cst_48 = arith.constant dense<0.000000e+00> : vector<1x128xf32>
    %167 = tpu.matmul %162, %166, %cst_48 {dimension_numbers = #tpu.dot_dimension_numbers<[1], [0], [0], [1], [0, 0, 1, 1], [], []>} : vector<1x32xf32>, vector<32x128xf32>, vector<1x128xf32> -> vector<1x128xf32>
    %168 = arith.addf %165, %167 : vector<1x128xf32>
    %169 = vector.extract_strided_slice %168 {offsets = [0, 0], sizes = [1, 96], strides = [1, 1]} : vector<1x128xf32> to vector<1x96xf32>
    %170 = arith.negf %169 : vector<1x96xf32>
    %171 = math.exp %170 : vector<1x96xf32>
    %cst_49 = arith.constant 1.000000e+00 : f32
    %172 = vector.broadcast %cst_49 : f32 to vector<1x96xf32>
    %173 = arith.addf %172, %171 : vector<1x96xf32>
    %174 = arith.divf %172, %173 : vector<1x96xf32>
    %175 = vector.extract_strided_slice %174 {offsets = [0, 0], sizes = [1, 32], strides = [1, 1]} : vector<1x96xf32> to vector<1x32xf32>
    %176 = vector.extract_strided_slice %174 {offsets = [0, 32], sizes = [1, 32], strides = [1, 1]} : vector<1x96xf32> to vector<1x32xf32>
    %177 = vector.extract_strided_slice %174 {offsets = [0, 64], sizes = [1, 32], strides = [1, 1]} : vector<1x96xf32> to vector<1x32xf32>
    %178 = vector.extract_strided_slice %168 {offsets = [0, 96], sizes = [1, 32], strides = [1, 1]} : vector<1x128xf32> to vector<1x32xf32>
    %179 = math.tanh %178 : vector<1x32xf32>
    %180 = arith.mulf %176, %160 : vector<1x32xf32>
    %181 = arith.mulf %175, %179 : vector<1x32xf32>
    %182 = arith.addf %180, %181 : vector<1x32xf32>
    %183 = math.tanh %182 : vector<1x32xf32>
    %184 = arith.mulf %177, %183 : vector<1x32xf32>
    %c0_50 = arith.constant 0 : index
    %c0_51 = arith.constant 0 : index
    %185 = vector.load %arg5[%c0_50, %c0_51] : memref<32x128xf32, #tpu.memory_space<vmem>>, vector<32x128xf32>
    %cst_52 = arith.constant dense<0.000000e+00> : vector<1x128xf32>
    %186 = tpu.matmul %184, %185, %cst_52 {dimension_numbers = #tpu.dot_dimension_numbers<[1], [0], [0], [1], [0, 0, 1, 1], [], []>} : vector<1x32xf32>, vector<32x128xf32>, vector<1x128xf32> -> vector<1x128xf32>
    %c0_53 = arith.constant 0 : index
    %c0_54 = arith.constant 0 : index
    %187 = vector.load %arg6[%c0_53, %c0_54] : memref<1x128xf32, #tpu.memory_space<vmem>>, vector<1x128xf32>
    %188 = arith.addf %186, %187 : vector<1x128xf32>
    %c0_55 = arith.constant 0 : index
    %c0_56 = arith.constant 0 : index
    %189 = vector.load %arg7[%c0_55, %c0_56] : memref<1x128xf32, #tpu.memory_space<vmem>>, vector<1x128xf32>
    tpu.vector_store %arg7[%c0_55, %c0_56], %188 {strides = array<i32>} : memref<1x128xf32, #tpu.memory_space<vmem>>, vector<1x128xf32>,
    return
  }
}

</mosaic_0001>

<bundles_post_ra>
// kernel: tpu_custom_call.1
= control target key start
LH: loop header
LB: loop body
LE: loop exit
PB: predicated region body
PF: predicated region fallthrough
CT: control target
= control target key end

     0   :  { %12 = vsyncpa [#allocation6], 0  ;;  %s1800_s0 = inlined_call_operand.hbm [shape: s32[8], index: 0, kind: input, shape index: {}]   ;;  %s1801_s1 = inlined_call_operand.hbm [shape: f32[8,16], index: 1, kind: input, shape index: {}]   ;;  %s1802_s2 = inlined_call_operand.hbm [shape: f32[16,128], index: 2, kind: input, shape index: {}]   ;;  %s1803_s3 = inlined_call_operand.hbm [shape: f32[32,128], index: 3, kind: input, shape index: {}]   ;;  %s1804_s4 = inlined_call_operand.vmem [shape: f32[1,128], index: 4, kind: input, shape index: {}]   ;;  %s1805_s5 = inlined_call_operand.hbm [shape: f32[32,128], index: 5, kind: input, shape index: {}]   ;;  %s1806_s6 = inlined_call_operand.vmem [shape: f32[1,128], index: 6, kind: input, shape index: {}]   ;;  %s1807_s7 = inlined_call_operand.hbm [shape: f32[1,128], index: 7, kind: output, shape index: {}]  }
   0x1   :  { %13 = vsyncpa [#allocation4], 0 }
   0x2   :  { %14 = vsyncpa [#allocation9], 0 }
   0x3   :  { %15 = vsyncpa [#allocation12], 0 }
   0x4   :  { %16 = vsyncpa [#allocation5], 0  ;;  %s1553_s24 = smov [#allocation8]   ;;  %s1423_s28 = scalar_lea.hbm %s1802_s2, 256 }
   0x5   :  { %s40_s25 = sshll.u32 %s1553_s24, 4  ;;  %p1424_p0 = scmp.ne.s32.totalorder %s1802_s2, %s1423_s28  ;;  %s41_s25 = int_to_ptr.vmem [resolvable:$true] %s40_s25 }
   0x6   :  { %p1427_p1 = scmp.lt.u32.totalorder %s1423_s28, %s1802_s2 }
   0x8   :  { %p1429_p2 = pnand %p1427_p1, %p1424_p0 }
   0xa   :  { %1432 = shalt.err (!%p1429_p2)
}
   0xb   :  { %s1433_s10 = scalar_lea.vmem %s41_s25, 256  ;;  %p1438_p4 = scmp.lt.s32.totalorder %s41_s25, %s41_s25 }
   0xc   :  { %p1434_p3 = scmp.ne.s32.totalorder %s41_s25, %s1433_s10  ;;  %p1439_p5 = scmp.lt.s32.totalorder %s1433_s10, %s1433_s10 }
   0xe   :  { %p1440_p6 = por %p1439_p5, %p1438_p4 }
  0x10   :  { %p1441_p7 = pnand %p1440_p6, %p1434_p3 }
  0x12   :  { %1444 = shalt.err (!%p1441_p7)
}
  0x13   :  { %s1554_s11 = smov 128   ;;  %s1555_s12 = smov 8  }
  0x14   :  { %46 = dma.hbm_to_vmem [thread:$0]  %s1802_s2, 256, %s41_s25, [#allocation9], %s1554_s11, %s1554_s11, %s1555_s12  }
  0x15   :  { %s1445_s17 = scalar_lea.hbm %s1800_s0, 16 }
  0x16   :  { %p1446_p8 = scmp.ne.s32.totalorder %s1800_s0, %s1445_s17  ;;  %p1449_p9 = scmp.lt.u32.totalorder %s1445_s17, %s1800_s0 }
  0x18   :  { %p1451_p10 = pnand %p1449_p9, %p1446_p8 }
  0x1a   :  { %1454 = shalt.err (!%p1451_p10)
}
  0x1b   :  { %s1556_s22 = smov [#allocation3]   ;;  %s1557_s2 = smov [#allocation7]  }
  0x1c   :  { %24 = dma.hbm_to_smem %s1800_s0, 16, %s1556_s22, [#allocation6]  }
  0x1d   :  { %s31_s25 = sshll.u32 %s1557_s2, 4  ;;  %s1558_s26 = smov [#allocation10]   ;;  %s32_s25 = int_to_ptr.vmem [resolvable:$true] %s31_s25 }
  0x1e   :  { %s52_s27 = sshll.u32 %s1558_s26, 4  ;;  %s1455_s30 = scalar_lea.hbm %s1801_s1, 128  ;;  %s1633_s27 = int_to_ptr.vmem [resolvable:$true] %s52_s27 }
  0x1f   :  { %p1456_p11 = scmp.ne.s32.totalorder %s1801_s1, %s1455_s30  ;;  %p1459_p12 = scmp.lt.u32.totalorder %s1455_s30, %s1801_s1 }
  0x21   :  { %p1461_p13 = pnand %p1459_p12, %p1456_p11 }
  0x23   :  { %1464 = shalt.err (!%p1461_p13)
}
  0x24   :  { %s1465_s0 = scalar_lea.vmem %s32_s25, 128  ;;  %p1470_p1 = scmp.lt.s32.totalorder %s32_s25, %s32_s25 }
  0x25   :  { %p1466_p0 = scmp.ne.s32.totalorder %s32_s25, %s1465_s0  ;;  %p1471_p2 = scmp.lt.s32.totalorder %s1465_s0, %s1465_s0 }
  0x27   :  { %p1472_p3 = por %p1471_p2, %p1470_p1 }
  0x29   :  { %p1473_p4 = pnand %p1472_p3, %p1466_p0 }
  0x2b   :  { %1476 = shalt.err (!%p1473_p4)
}
  0x2c   :  { %34 = dma.hbm_to_vmem [thread:$0]  %s1801_s1, 128, %s32_s25, [#allocation4]  }
  0x2d   :  { %s1477_s18 = scalar_lea.hbm %s1803_s3, 512 }
  0x2e   :  { %p1478_p5 = scmp.ne.s32.totalorder %s1803_s3, %s1477_s18  ;;  %p1481_p6 = scmp.lt.u32.totalorder %s1477_s18, %s1803_s3 }
  0x30   :  { %p1483_p7 = pnand %p1481_p6, %p1478_p5 }
  0x32   :  { %1486 = shalt.err (!%p1483_p7)
}
  0x33   :  { %s1487_s23 = scalar_lea.vmem %s1633_s27, 512  ;;  %p1492_p9 = scmp.lt.s32.totalorder %s1633_s27, %s1633_s27 }
  0x34   :  { %p1488_p8 = scmp.ne.s32.totalorder %s1633_s27, %s1487_s23  ;;  %p1493_p10 = scmp.lt.s32.totalorder %s1487_s23, %s1487_s23 }
  0x36   :  { %p1494_p11 = por %p1493_p10, %p1492_p9 }
  0x38   :  { %p1495_p12 = pnand %p1494_p11, %p1488_p8 }
  0x3a   :  { %1498 = shalt.err (!%p1495_p12)
}
  0x3b   :  { %58 = dma.hbm_to_vmem [thread:$0]  %s1803_s3, 512, %s1633_s27, [#allocation9], %s1554_s11, %s1554_s11, %s1555_s12  }
  0x3c   :  { %s1559_s2 = smov [#allocation11]   ;;  %s1499_s29 = scalar_lea.hbm %s1805_s5, 512 }
  0x3d   :  { %s66_s25 = sshll.u32 %s1559_s2, 4  ;;  %p1500_p13 = scmp.ne.s32.totalorder %s1805_s5, %s1499_s29  ;;  %s67_s25 = int_to_ptr.vmem [resolvable:$true] %s66_s25 }
  0x3e   :  { %p1503_p0 = scmp.lt.u32.totalorder %s1499_s29, %s1805_s5 }
  0x40   :  { %p1505_p1 = pnand %p1503_p0, %p1500_p13 }
  0x42   :  { %1508 = shalt.err (!%p1505_p1)
}
  0x43   :  { %s1509_s13 = scalar_lea.vmem %s67_s25, 512  ;;  %p1514_p3 = scmp.lt.s32.totalorder %s67_s25, %s67_s25 }
  0x44   :  { %p1510_p2 = scmp.ne.s32.totalorder %s67_s25, %s1509_s13  ;;  %p1515_p4 = scmp.lt.s32.totalorder %s1509_s13, %s1509_s13 }
  0x46   :  { %p1516_p5 = por %p1515_p4, %p1514_p3 }
  0x48   :  { %p1517_p6 = pnand %p1516_p5, %p1510_p2 }
  0x4a   :  { %1520 = shalt.err (!%p1517_p6)
}
  0x4b   :  { %72 = dma.hbm_to_vmem [thread:$0]  %s1805_s5, 512, %s67_s25, [#allocation12], %s1554_s11, %s1554_s11, %s1555_s12  }
  0x4c   :  { %1543 = dma.done.wait [#allocation6], 16  }
  0x4d   :  { %1544 = vsyncadd [#allocation6], 4294967280 }
  0x4e   :  { %1545 = dma.done.wait [#allocation4], 128  }
  0x4f   :  { %1546 = vsyncadd [#allocation4], 4294967168 }
  0x50   :  { %1547 = dma.done.wait [#allocation9], 768  }
  0x51   :  { %1548 = vsyncadd [#allocation9], 4294966528 }
  0x52   :  { %1549 = dma.done.wait [#allocation12], 512  }
  0x53   :  { %1550 = vsyncadd [#allocation12], 4294966784 }
  0x54   :  { %90 = sfence }
  0x55   :  { %v92_v0 = vld [vmem:[#allocation8] sm:$0xff]  ;;  %v93_v1 = vld [vmem:[#allocation8 + $0x8] sm:$0xff]  ;;  %v1560_v2 = vmov 0.0|0.0   ;;  %vm1561_vm0 = vmmov 0   ;;  %v1562_v4 = vmov 0.0   ;;  %v179_v5 = vld [vmem:[#allocation10] sm:$0xff] }
  0x56   :  { %1289 = vmatprep.subr.bf16.mxu0 %v1560_v2  ;;  %v1290_v3 = vpack.c.bf16 %v93_v1, %v92_v0  ;;  %1187 = vmatprep.mubr.msk.f32.mxu0 %vm1561_vm0, %v1562_v4  ;;  %v180_v6 = vld [vmem:[#allocation10 + $0x8] sm:$0xff]  ;;  %v181_v7 = vld [vmem:[#allocation10 + $0x10] sm:$0xff]  ;;  %v182_v9 = vld [vmem:[#allocation10 + $0x18] sm:$0xff]  ;;  %vm101_vm1 = vcmask 130048   ;;  %s176_s12 = sld [smem:[#allocation3]]  ;;  %s1563_s14 = smov 32  }
  0x57   :  { %1292 = vmatprep.subr.bf16.mxu1 %v1560_v2  ;;  %v1686_v8 = vpack.c.bf16 %v180_v6, %v179_v5  ;;  %1198 = vmatprep.mubr.msk.f32.mxu1 %vm1561_vm0, %v1562_v4  ;;  %v91_v10 = vld [vmem:[#allocation7] sm:$0xff]  ;;  %v1691_v11 = vpack.c.bf16 %v182_v9, %v181_v7  ;;  %v1110_v12 = vld [vmem:[%s1804_s4] ss:$0 sm:$0xff]  ;;  %s1564_s4 = smov 64   ;;  %vm183_vm2 = vcmask 261120   ;;  %s1113_s15 = sld [smem:[#allocation3 + $0x1]] }
  0x58   :  { %1291 = vmatpush3.bf16.msra.mxu0 %v1290_v3  ;;  %s1116_s17 = sld [smem:[#allocation3 + $0x2]]  ;;  %s1119_s19 = sld [smem:[#allocation3 + $0x3]] }
  0x59   :  { %1294 = vmatpush3.bf16.msra.mxu1 %v1686_v8  ;;  %1298 = vmatprep.subr.bf16.mxu0 %v1560_v2  ;;  %s1122_s21 = sld [smem:[#allocation3 + $0x4]]  ;;  %s1125_s23 = sld [smem:[#allocation3 + $0x5]] }
  0x5a   :  { %1295 = vmatprep.subr.bf16.mxu1 %v1560_v2  ;;  %s1128_s24 = sld [smem:[#allocation3 + $0x6]]  ;;  %s1131_s25 = sld [smem:[#allocation3 + $0x7]] }
  0x5b   :  { %1188 = vmatmul.mubr.msk.f32.vlgmr.msra.gmra.mrb[0].mxu0 %vm101_vm1, %v91_v10  ;;  %s1565_s30 = smov [#allocation13]  }
  0x5c   :  { %1300 = vmatpush3.bf16.msra.mxu0 %v1686_v8  ;;  %1209 = vmatprep.mubr.msk.f32.mxu0 %vm1561_vm0, %v1562_v4  ;;  %s177_s0 = scalar_lea.vmem [#allocation2], %s176_s12  ;;  %s1090_s8 = sshll.u32 %s1565_s30, 4  ;;  %s1091_s8 = int_to_ptr.vmem [resolvable:$true] %s1090_s8 }
  0x5d   :  { %1297 = vmatpush3.bf16.msra.mxu1 %v1691_v11  ;;  %1301 = vmatprep.subr.bf16.mxu0 %v1560_v2  ;;  %s283_s16 = scalar_lea.vmem [#allocation2], %s1113_s15  ;;  %s1521_s9 = scalar_lea.vmem %s1091_s8, 16 }
  0x5e   :  { %1304 = vmatprep.subr.bf16.mxu1 %v1560_v2  ;;  %s386_s18 = scalar_lea.vmem [#allocation2], %s1116_s17  ;;  %s489_s20 = scalar_lea.vmem [#allocation2], %s1119_s19 }
  0x5f   :  { %s592_s22 = scalar_lea.vmem [#allocation2], %s1122_s21  ;;  %s695_s1 = scalar_lea.vmem [#allocation2], %s1125_s23 }
  0x60   :  { %1199 = vmatmul.mubr.f32.vlgmr.msra.gmra.mrb[0].mxu1 %v1562_v4  ;;  %1303 = vmatpush3.bf16.msra.mxu0 %v1691_v11  ;;  %s798_s2 = scalar_lea.vmem [#allocation2], %s1128_s24  ;;  %s901_s26 = scalar_lea.vmem [#allocation2], %s1131_s25 }
  0x61   :  { %1306 = vmatpush3.bf16.msra.mxu1 %v1686_v8  ;;  %1220 = vmatprep.mubr.msk.f32.mxu1 %vm1561_vm0, %v1562_v4  ;;  %p1522_p7 = scmp.ne.s32.totalorder %s1091_s8, %s1521_s9  ;;  %s1525_s10 = scalar_lea.vmem %s1091_s8, 32 }
  0x62   :  { %1307 = vmatprep.subr.bf16.mxu1 %v1560_v2  ;;  %1310 = vmatprep.subr.bf16.mxu0 %v1560_v2  ;;  %p1526_p8 = scmp.lt.s32.totalorder %s1091_s8, %s1091_s8  ;;  %p1527_p9 = scmp.lt.s32.totalorder %s1525_s10, %s1521_s9 }
  0x64   :  { %p1528_p10 = por %p1527_p9, %p1526_p8 }
  0x65   :  { %1309 = vmatpush3.bf16.msra.mxu1 %v1691_v11 }
  0x66   :  { %1316 = vmatprep.subr.bf16.mxu1 %v1560_v2  ;;  %p1529_p11 = pnand %p1528_p10, %p1522_p7 }
 0x12e   :  { %v171_v13 = vpop.f32.mrb[0].mxu0 }
 0x12f   :  { %v172_v14 = vadd.f32 %v1110_v12, %v171_v13  ;;  %v1189_v15 = vpop.f32.mrb[1].mxu0 }
 0x131   :  { %175 = vst [vmem:[#allocation2] sm:$0xff] %v172_v14 }
 0x133   :  { %v253_v16 = vpop.f32.mrb[0].mxu1 }
 0x134   :  { %v1200_v17 = vpop.f32.mrb[1].mxu1 }
 0x138   :  { %v178_v18 = vld [vmem:[%s177_s0] sm:$0x1] }
 0x139   :  { %v257_v19 = vadd.f32 %v253_v16, %v178_v18  ;;  %v284_v34 = vld [vmem:[%s283_s16] sm:$0x1] }
 0x13a   :  { %v387_v52 = vld [vmem:[%s386_s18] sm:$0x1] }
 0x13b   :  { %1359 = vtanh.f32 %v257_v19  ;;  %v1112_v21 = vmul.f32 -1.442695, %v257_v19  ;;  %v490_v9 = vld [vmem:[%s489_s20] sm:$0x1] }
 0x13d   :  { %1361 = vpow2.f32 %v1112_v21 }
 0x145   :  { %v1360_v20 = vpop.eup %1359 }
 0x146   :  { %267 = vrot.lane.b32.xlu0 %v1360_v20, %s1563_s14 }
 0x147   :  { %v1362_v22 = vpop.eup %1361 }
 0x148   :  { %v261_v23 = vadd.f32 1.0, %v1362_v22 }
 0x14a   :  { %1363 = vrcp.f32 %v261_v23 }
 0x154   :  { %v1364_v24 = vpop.eup %1363 }
 0x155   :  { %v265_v27 = vmul.f32 0.0, %v1364_v24 }
 0x1b8   :  { %v268_v25 = vpop.permute.xlu0 %267 }
 0x1b9   :  { %v270_v26 = vmul.f32 %v1364_v24, %v268_v25 }
 0x1bb   :  { %272 = vrot.lane.b32.xlu0 %v270_v26, %s1563_s14 }
 0x22d   :  { %v273_v28 = vpop.permute.xlu0 %272 }
 0x22e   :  { %v275_v29 = vadd.f32 %v273_v28, %v265_v27  ;;  %v593_v28 = vld [vmem:[%s592_s22] sm:$0x1] }
 0x230   :  { %1365 = vtanh.f32 %v275_v29 }
 0x23a   :  { %v1366_v30 = vpop.eup %1365 }
 0x23b   :  { %278 = vrot.lane.b32.xlu1 %v1366_v30, %s1563_s14 }
 0x2ad   :  { %v279_v31 = vpop.permute.xlu1 %278 }
 0x2ae   :  { %v281_v32 = vmul.f32 %v1364_v24, %v279_v31 }
 0x2b0   :  { %286 = vrot.lane.b32.xlu1 %v281_v32, %s1564_s4 }
 0x322   :  { %v287_v33 = vpop.permute.xlu1 %286 }
 0x323   :  { %1210 = vmatmul.mubr.msk.f32.vlgmr.msra.gmra.mrb[2].mxu0 %vm183_vm2, %v287_v33 }
 0x324   :  { %1312 = vmatpush3.bf16.msra.mxu0 %v1686_v8  ;;  %1231 = vmatprep.mubr.msk.f32.mxu0 %vm1561_vm0, %v1562_v4 }
 0x325   :  { %1313 = vmatprep.subr.bf16.mxu0 %v1560_v2 }
 0x328   :  { %1315 = vmatpush3.bf16.msra.mxu0 %v1691_v11 }
 0x329   :  { %1322 = vmatprep.subr.bf16.mxu0 %v1560_v2 }
 0x3f6   :  { %v356_v35 = vpop.f32.mrb[2].mxu0 }
 0x3f7   :  { %v360_v36 = vadd.f32 %v356_v35, %v284_v34  ;;  %v1211_v37 = vpop.f32.mrb[3].mxu0 }
 0x3f9   :  { %1367 = vtanh.f32 %v360_v36  ;;  %v1115_v39 = vmul.f32 -1.442695, %v360_v36 }
 0x3fb   :  { %1369 = vpow2.f32 %v1115_v39 }
 0x403   :  { %v1368_v38 = vpop.eup %1367 }
 0x404   :  { %370 = vrot.lane.b32.xlu0 %v1368_v38, %s1563_s14 }
 0x405   :  { %v1370_v40 = vpop.eup %1369 }
 0x406   :  { %v364_v41 = vadd.f32 1.0, %v1370_v40 }
 0x408   :  { %1371 = vrcp.f32 %v364_v41 }
 0x412   :  { %v1372_v42 = vpop.eup %1371 }
 0x413   :  { %v368_v45 = vmul.f32 %v1372_v42, %v275_v29 }
 0x476   :  { %v371_v43 = vpop.permute.xlu0 %370 }
 0x477   :  { %v373_v44 = vmul.f32 %v1372_v42, %v371_v43 }
 0x479   :  { %375 = vrot.lane.b32.xlu1 %v373_v44, %s1563_s14 }
 0x4eb   :  { %v376_v46 = vpop.permute.xlu1 %375 }
 0x4ec   :  { %v378_v47 = vadd.f32 %v376_v46, %v368_v45  ;;  %v696_v46 = vld [vmem:[%s695_s1] sm:$0x1] }
 0x4ee   :  { %1373 = vtanh.f32 %v378_v47 }
 0x4f8   :  { %v1374_v48 = vpop.eup %1373 }
 0x4f9   :  { %381 = vrot.lane.b32.xlu0 %v1374_v48, %s1563_s14 }
 0x56b   :  { %v382_v49 = vpop.permute.xlu0 %381 }
 0x56c   :  { %v384_v50 = vmul.f32 %v1372_v42, %v382_v49 }
 0x56e   :  { %389 = vrot.lane.b32.xlu1 %v384_v50, %s1564_s4 }
 0x5e0   :  { %v390_v51 = vpop.permute.xlu1 %389 }
 0x5e1   :  { %1221 = vmatmul.mubr.msk.f32.vlgmr.msra.gmra.mrb[2].mxu1 %vm183_vm2, %v390_v51 }
 0x5e2   :  { %1318 = vmatpush3.bf16.msra.mxu1 %v1686_v8  ;;  %1242 = vmatprep.mubr.msk.f32.mxu1 %vm1561_vm0, %v1562_v4 }
 0x5e3   :  { %1319 = vmatprep.subr.bf16.mxu1 %v1560_v2 }
 0x5e6   :  { %1321 = vmatpush3.bf16.msra.mxu1 %v1691_v11 }
 0x5e7   :  { %1328 = vmatprep.subr.bf16.mxu1 %v1560_v2 }
 0x6b4   :  { %v459_v53 = vpop.f32.mrb[2].mxu1 }
 0x6b5   :  { %v463_v54 = vadd.f32 %v459_v53, %v387_v52  ;;  %v1222_v55 = vpop.f32.mrb[3].mxu1 }
 0x6b7   :  { %1375 = vtanh.f32 %v463_v54  ;;  %v1118_v57 = vmul.f32 -1.442695, %v463_v54 }
 0x6b9   :  { %1377 = vpow2.f32 %v1118_v57 }
 0x6c1   :  { %v1376_v56 = vpop.eup %1375 }
 0x6c2   :  { %473 = vrot.lane.b32.xlu0 %v1376_v56, %s1563_s14 }
 0x6c3   :  { %v1378_v58 = vpop.eup %1377 }
 0x6c4   :  { %v467_v59 = vadd.f32 1.0, %v1378_v58 }
 0x6c6   :  { %1379 = vrcp.f32 %v467_v59 }
 0x6d0   :  { %v1380_v60 = vpop.eup %1379 }
 0x6d1   :  { %v471_v63 = vmul.f32 %v1380_v60, %v378_v47 }
 0x734   :  { %v474_v61 = vpop.permute.xlu0 %473 }
 0x735   :  { %v476_v62 = vmul.f32 %v1380_v60, %v474_v61 }
 0x737   :  { %478 = vrot.lane.b32.xlu1 %v476_v62, %s1563_s14  ;;  %v799_v62 = vld [vmem:[%s798_s2] sm:$0x1] }
 0x7a9   :  { %v479_v0 = vpop.permute.xlu1 %478 }
 0x7aa   :  { %v481_v1 = vadd.f32 %v479_v0, %v471_v63 }
 0x7ac   :  { %1381 = vtanh.f32 %v481_v1 }
 0x7b6   :  { %v1382_v3 = vpop.eup %1381 }
 0x7b7   :  { %484 = vrot.lane.b32.xlu0 %v1382_v3, %s1563_s14 }
 0x829   :  { %v485_v5 = vpop.permute.xlu0 %484 }
 0x82a   :  { %v487_v6 = vmul.f32 %v1380_v60, %v485_v5 }
 0x82c   :  { %492 = vrot.lane.b32.xlu1 %v487_v6, %s1564_s4 }
 0x89e   :  { %v493_v7 = vpop.permute.xlu1 %492 }
 0x89f   :  { %1232 = vmatmul.mubr.msk.f32.vlgmr.msra.gmra.mrb[4].mxu0 %vm183_vm2, %v493_v7 }
 0x8a0   :  { %1324 = vmatpush3.bf16.msra.mxu0 %v1686_v8  ;;  %1253 = vmatprep.mubr.msk.f32.mxu0 %vm1561_vm0, %v1562_v4 }
 0x8a1   :  { %1325 = vmatprep.subr.bf16.mxu0 %v1560_v2 }
 0x8a4   :  { %1327 = vmatpush3.bf16.msra.mxu0 %v1691_v11 }
 0x8a5   :  { %1334 = vmatprep.subr.bf16.mxu0 %v1560_v2 }
 0x972   :  { %v562_v10 = vpop.f32.mrb[4].mxu0 }
 0x973   :  { %v566_v12 = vadd.f32 %v562_v10, %v490_v9  ;;  %v1233_v13 = vpop.f32.mrb[5].mxu0 }
 0x975   :  { %1383 = vtanh.f32 %v566_v12  ;;  %v1121_v15 = vmul.f32 -1.442695, %v566_v12 }
 0x977   :  { %1385 = vpow2.f32 %v1121_v15 }
 0x97f   :  { %v1384_v14 = vpop.eup %1383 }
 0x980   :  { %576 = vrot.lane.b32.xlu0 %v1384_v14, %s1563_s14 }
 0x981   :  { %v1386_v16 = vpop.eup %1385 }
 0x982   :  { %v570_v17 = vadd.f32 1.0, %v1386_v16 }
 0x984   :  { %1387 = vrcp.f32 %v570_v17 }
 0x98e   :  { %v1388_v18 = vpop.eup %1387 }
 0x98f   :  { %v574_v21 = vmul.f32 %v1388_v18, %v481_v1 }
 0x9f2   :  { %v577_v19 = vpop.permute.xlu0 %576 }
 0x9f3   :  { %v579_v20 = vmul.f32 %v1388_v18, %v577_v19  ;;  %v902_v19 = vld [vmem:[%s901_s26] sm:$0x1] }
 0x9f5   :  { %581 = vrot.lane.b32.xlu1 %v579_v20, %s1563_s14 }
 0xa67   :  { %v582_v22 = vpop.permute.xlu1 %581 }
 0xa68   :  { %v584_v23 = vadd.f32 %v582_v22, %v574_v21 }
 0xa6a   :  { %1389 = vtanh.f32 %v584_v23 }
 0xa74   :  { %v1390_v24 = vpop.eup %1389 }
 0xa75   :  { %587 = vrot.lane.b32.xlu0 %v1390_v24, %s1563_s14 }
 0xae7   :  { %v588_v25 = vpop.permute.xlu0 %587 }
 0xae8   :  { %v590_v26 = vmul.f32 %v1388_v18, %v588_v25 }
 0xaea   :  { %595 = vrot.lane.b32.xlu1 %v590_v26, %s1564_s4 }
 0xb5c   :  { %v596_v27 = vpop.permute.xlu1 %595 }
 0xb5d   :  { %1243 = vmatmul.mubr.msk.f32.vlgmr.msra.gmra.mrb[4].mxu1 %vm183_vm2, %v596_v27 }
 0xb5e   :  { %1330 = vmatpush3.bf16.msra.mxu1 %v1686_v8  ;;  %1264 = vmatprep.mubr.msk.f32.mxu1 %vm1561_vm0, %v1562_v4 }
 0xb5f   :  { %1331 = vmatprep.subr.bf16.mxu1 %v1560_v2 }
 0xb62   :  { %1333 = vmatpush3.bf16.msra.mxu1 %v1691_v11 }
 0xb63   :  { %1340 = vmatprep.subr.bf16.mxu1 %v1560_v2 }
 0xc30   :  { %v665_v29 = vpop.f32.mrb[4].mxu1 }
 0xc31   :  { %v669_v30 = vadd.f32 %v665_v29, %v593_v28  ;;  %v1244_v31 = vpop.f32.mrb[5].mxu1 }
 0xc33   :  { %1391 = vtanh.f32 %v669_v30  ;;  %v1124_v33 = vmul.f32 -1.442695, %v669_v30 }
 0xc35   :  { %1393 = vpow2.f32 %v1124_v33  ;;  %v1003_v33 = vld [vmem:[#allocation11] sm:$0xff] }
 0xc3d   :  { %v1392_v32 = vpop.eup %1391 }
 0xc3e   :  { %679 = vrot.lane.b32.xlu0 %v1392_v32, %s1563_s14 }
 0xc3f   :  { %v1394_v34 = vpop.eup %1393 }
 0xc40   :  { %v673_v35 = vadd.f32 1.0, %v1394_v34  ;;  %v1004_v34 = vld [vmem:[#allocation11 + $0x8] sm:$0xff] }
 0xc42   :  { %1395 = vrcp.f32 %v673_v35  ;;  %v1005_v35 = vld [vmem:[#allocation11 + $0x10] sm:$0xff] }
 0xc4c   :  { %v1396_v36 = vpop.eup %1395 }
 0xc4d   :  { %v677_v39 = vmul.f32 %v1396_v36, %v584_v23 }
 0xcb0   :  { %v680_v37 = vpop.permute.xlu0 %679 }
 0xcb1   :  { %v682_v38 = vmul.f32 %v1396_v36, %v680_v37  ;;  %v1006_v37 = vld [vmem:[#allocation11 + $0x18] sm:$0xff] }
 0xcb3   :  { %684 = vrot.lane.b32.xlu1 %v682_v38, %s1563_s14  ;;  %v1344_v38 = vpack.c.bf16 %v1006_v37, %v1005_v35 }
 0xd25   :  { %v685_v40 = vpop.permute.xlu1 %684 }
 0xd26   :  { %v687_v41 = vadd.f32 %v685_v40, %v677_v39 }
 0xd28   :  { %1397 = vtanh.f32 %v687_v41 }
 0xd32   :  { %v1398_v42 = vpop.eup %1397 }
 0xd33   :  { %690 = vrot.lane.b32.xlu0 %v1398_v42, %s1563_s14 }
 0xda5   :  { %v691_v43 = vpop.permute.xlu0 %690 }
 0xda6   :  { %v693_v44 = vmul.f32 %v1396_v36, %v691_v43  ;;  %v1341_v36 = vpack.c.bf16 %v1004_v34, %v1003_v33  ;;  %v1007_v43 = vld [vmem:[%s1806_s6] sm:$0x1] }
 0xda8   :  { %698 = vrot.lane.b32.xlu1 %v693_v44, %s1564_s4 }
 0xe1a   :  { %v699_v45 = vpop.permute.xlu1 %698 }
 0xe1b   :  { %1254 = vmatmul.mubr.msk.f32.vlgmr.msra.gmra.mrb[6].mxu0 %vm183_vm2, %v699_v45 }
 0xe1c   :  { %1336 = vmatpush3.bf16.msra.mxu0 %v1686_v8  ;;  %1275 = vmatprep.mubr.msk.f32.mxu0 %vm1561_vm0, %v1562_v4 }
 0xe1d   :  { %1337 = vmatprep.subr.bf16.mxu0 %v1560_v2 }
 0xe20   :  { %1339 = vmatpush3.bf16.msra.mxu0 %v1691_v11 }
 0xeee   :  { %v768_v47 = vpop.f32.mrb[6].mxu0 }
 0xeef   :  { %v772_v48 = vadd.f32 %v768_v47, %v696_v46  ;;  %v1255_v49 = vpop.f32.mrb[7].mxu0 }
 0xef1   :  { %1399 = vtanh.f32 %v772_v48  ;;  %v1127_v51 = vmul.f32 -1.442695, %v772_v48 }
 0xef3   :  { %1401 = vpow2.f32 %v1127_v51 }
 0xefb   :  { %v1400_v50 = vpop.eup %1399 }
 0xefc   :  { %782 = vrot.lane.b32.xlu0 %v1400_v50, %s1563_s14 }
 0xefd   :  { %v1402_v8 = vpop.eup %1401 }
 0xefe   :  { %v776_v52 = vadd.f32 1.0, %v1402_v8 }
 0xf00   :  { %1403 = vrcp.f32 %v776_v52 }
 0xf0a   :  { %v1404_v53 = vpop.eup %1403 }
 0xf0b   :  { %v780_v11 = vmul.f32 %v1404_v53, %v687_v41 }
 0xf6e   :  { %v783_v54 = vpop.permute.xlu0 %782 }
 0xf6f   :  { %v785_v55 = vmul.f32 %v1404_v53, %v783_v54 }
 0xf71   :  { %787 = vrot.lane.b32.xlu1 %v785_v55, %s1563_s14 }
 0xfe3   :  { %v788_v56 = vpop.permute.xlu1 %787 }
 0xfe4   :  { %v790_v57 = vadd.f32 %v788_v56, %v780_v11 }
 0xfe6   :  { %1405 = vtanh.f32 %v790_v57 }
 0xff0   :  { %v1406_v58 = vpop.eup %1405 }
 0xff1   :  { %793 = vrot.lane.b32.xlu0 %v1406_v58, %s1563_s14 }
0x1063   :  { %v794_v59 = vpop.permute.xlu0 %793 }
0x1064   :  { %v796_v60 = vmul.f32 %v1404_v53, %v794_v59 }
0x1066   :  { %801 = vrot.lane.b32.xlu1 %v796_v60, %s1564_s4 }
0x10d8   :  { %v802_v61 = vpop.permute.xlu1 %801 }
0x10d9   :  { %1265 = vmatmul.mubr.msk.f32.vlgmr.msra.gmra.mrb[6].mxu1 %vm183_vm2, %v802_v61 }
0x10da   :  { %1286 = vmatprep.mubr.msk.f32.mxu1 %vm1561_vm0, %v1562_v4  ;;  %1342 = vmatpush3.bf16.msra.mxu1 %v1341_v36 }
0x10db   :  { %1343 = vmatprep.subr.bf16.mxu1 %v1560_v2 }
0x10de   :  { %1345 = vmatpush3.bf16.msra.mxu1 %v1344_v38 }
0x11ac   :  { %v871_v63 = vpop.f32.mrb[6].mxu1 }
0x11ad   :  { %v875_v0 = vadd.f32 %v871_v63, %v799_v62  ;;  %v1266_v1 = vpop.f32.mrb[7].mxu1 }
0x11af   :  { %1407 = vtanh.f32 %v875_v0  ;;  %v1130_v5 = vmul.f32 -1.442695, %v875_v0 }
0x11b1   :  { %1409 = vpow2.f32 %v1130_v5 }
0x11b9   :  { %v1408_v3 = vpop.eup %1407 }
0x11ba   :  { %885 = vrot.lane.b32.xlu0 %v1408_v3, %s1563_s14 }
0x11bb   :  { %v1410_v6 = vpop.eup %1409 }
0x11bc   :  { %v879_v7 = vadd.f32 1.0, %v1410_v6 }
0x11be   :  { %1411 = vrcp.f32 %v879_v7 }
0x11c8   :  { %v1412_v9 = vpop.eup %1411 }
0x11c9   :  { %v883_v4 = vmul.f32 %v1412_v9, %v790_v57 }
0x122c   :  { %v886_v10 = vpop.permute.xlu0 %885 }
0x122d   :  { %v888_v12 = vmul.f32 %v1412_v9, %v886_v10 }
0x122f   :  { %890 = vrot.lane.b32.xlu1 %v888_v12, %s1563_s14 }
0x12a1   :  { %v891_v13 = vpop.permute.xlu1 %890 }
0x12a2   :  { %v893_v14 = vadd.f32 %v891_v13, %v883_v4 }
0x12a4   :  { %1413 = vtanh.f32 %v893_v14 }
0x12ae   :  { %v1414_v15 = vpop.eup %1413 }
0x12af   :  { %896 = vrot.lane.b32.xlu0 %v1414_v15, %s1563_s14 }
0x1321   :  { %v897_v16 = vpop.permute.xlu0 %896 }
0x1322   :  { %v899_v17 = vmul.f32 %v1412_v9, %v897_v16 }
0x1324   :  { %904 = vrot.lane.b32.xlu1 %v899_v17, %s1564_s4 }
0x1396   :  { %v905_v18 = vpop.permute.xlu1 %904 }
0x1397   :  { %1276 = vmatmul.mubr.msk.f32.vlgmr.msra.gmra.mrb[8].mxu0 %vm183_vm2, %v905_v18 }
0x146a   :  { %v974_v20 = vpop.f32.mrb[8].mxu0 }
0x146b   :  { %v978_v21 = vadd.f32 %v974_v20, %v902_v19  ;;  %v1277_v22 = vpop.f32.mrb[9].mxu0 }
0x146d   :  { %1415 = vtanh.f32 %v978_v21  ;;  %v1133_v24 = vmul.f32 -1.442695, %v978_v21 }
0x146f   :  { %1417 = vpow2.f32 %v1133_v24 }
0x1477   :  { %v1416_v23 = vpop.eup %1415 }
0x1478   :  { %988 = vrot.lane.b32.xlu0 %v1416_v23, %s1563_s14 }
0x1479   :  { %v1418_v25 = vpop.eup %1417 }
0x147a   :  { %v982_v26 = vadd.f32 1.0, %v1418_v25 }
0x147c   :  { %1419 = vrcp.f32 %v982_v26 }
0x1486   :  { %v1420_v27 = vpop.eup %1419 }
0x1487   :  { %v986_v30 = vmul.f32 %v1420_v27, %v893_v14 }
0x14ea   :  { %v989_v28 = vpop.permute.xlu0 %988 }
0x14eb   :  { %v991_v29 = vmul.f32 %v1420_v27, %v989_v28 }
0x14ed   :  { %993 = vrot.lane.b32.xlu1 %v991_v29, %s1563_s14 }
0x155f   :  { %v994_v31 = vpop.permute.xlu1 %993 }
0x1560   :  { %v996_v32 = vadd.f32 %v994_v31, %v986_v30 }
0x1562   :  { %1421 = vtanh.f32 %v996_v32 }
0x156c   :  { %v1422_v39 = vpop.eup %1421 }
0x156d   :  { %999 = vrot.lane.b32.xlu0 %v1422_v39, %s1563_s14 }
0x15df   :  { %v1000_v40 = vpop.permute.xlu0 %999 }
0x15e0   :  { %v1002_v41 = vmul.f32 %v1420_v27, %v1000_v40 }
0x15e2   :  { %1009 = vrot.lane.b32.xlu1 %v1002_v41, %s1564_s4 }
0x1654   :  { %v1010_v42 = vpop.permute.xlu1 %1009 }
0x1655   :  { %1287 = vmatmul.mubr.msk.f32.vlgmr.msra.gmra.mrb[8].mxu1 %vm183_vm2, %v1010_v42 }
0x1728   :  { %v1079_v44 = vpop.f32.mrb[8].mxu1 }
0x1729   :  { %v1080_v45 = vadd.f32 %v1079_v44, %v1007_v43  ;;  %v1288_v2 = vpop.f32.mrb[9].mxu1 }
0x172b   :  { %1083 = vst [vmem:[#allocation13] sm:$0x1] %v1080_v45 }
0x172c   :  { %1532 = shalt.err (!%p1529_p11)
}
0x172d   :  { %s1533_s27 = scalar_lea.hbm %s1807_s7, 16 }
0x172e   :  { %p1534_p12 = scmp.ne.s32.totalorder %s1807_s7, %s1533_s27  ;;  %p1537_p13 = scmp.lt.u32.totalorder %s1533_s27, %s1807_s7 }
0x1730   :  { %p1539_p0 = pnand %p1537_p13, %p1534_p12 }
0x1732   :  { %1542 = shalt.err (!%p1539_p0)
}
0x1733   :  { %1093 = dma.vmem_to_hbm [thread:$0]  %s1091_s8, 16, %s1807_s7, [#allocation5]  }
0x1734   :  { %1551 = dma.done.wait [#allocation5], 16  }
0x1735   :  { %1552 = vsyncadd [#allocation5], 4294967280 }
0x1736   :  { %1097 = vsyncpa [#allocation4], 1 }
0x1737   :  { %1098 = vsyncpa [#allocation9], 1 }
0x1738   :  { %1099 = vsyncpa [#allocation12], 1 }
0x1739   :  { %1100 = vsyncpa [#allocation5], 1 }
0x173a   :  { %1101 = vsyncpa [#allocation6], 1 }

</bundles_post_ra>
